<compile_context>
chip_gen: v5e
topology: v5e:2x2
jax: 0.10.0
libtpu: 0.0.40
codegen_flags: <defaults>
</compile_context>

<pallas_src>
import numpy as np
import jax
import jax.numpy as jnp
from jax.experimental import pallas as pl
from jax.experimental.pallas import tpu as pltpu


_MAX_BATCH_TILE = 1024  # rows per grid step; double-buffered x+out stays ~1.7 MB


def _default_batch_tile(bs):
    # Large batches: 1024-row tiles (multiple of 8, ~roofline per the measured
    # tiled-add sweep).  Small batches: a single full-extent block (block dims
    # equal to the full array dims are always legal).
    return bs if bs <= _MAX_BATCH_TILE else _MAX_BATCH_TILE


def _mlp_kernel(x_ref, w1_ref, b1_ref, w2_ref, b2_ref, o_ref):
    # x_ref:  [tb, in_dim]         f32  (streams with the grid)
    # w1_ref: [in_dim, hidden_p]   f32 or bf16          -- VMEM-resident
    # b1_ref: [1, hidden_p]        f32                  -- VMEM-resident
    # w2_ref: [hidden_p, out_dim]  same dtype as w1     -- VMEM-resident
    # b2_ref: [1, out_dim]         f32                  -- VMEM-resident
    # o_ref:  [tb, out_dim]        f32  (streams with the grid)
    xv = x_ref[...].astype(w1_ref.dtype)       # in-kernel cast; no-op on f32 path
    h = jnp.dot(xv, w1_ref[...], preferred_element_type=jnp.float32)
    h = jnp.maximum(h + b1_ref[...], 0.0)      # bias + ReLU in f32 on the VPU
    h = h.astype(w2_ref.dtype)                 # feed MXU natively on bf16 path
    out = jnp.dot(h, w2_ref[...], preferred_element_type=jnp.float32) + b2_ref[...]
    o_ref[...] = out.astype(o_ref.dtype)


def prepare_params(w1, b1, w2, b2, compute_dtype=jnp.float32):
    """One-time (init-side) weight prep for the kernel.

    * Zero-pads the hidden dim up to a multiple of 128 lanes (math no-op).
    * Casts weights to the compute dtype (f32 or bf16); biases stay f32.
    Weights are expected in [in, out] layout.
    """
    in_dim, hidden = w1.shape
    out_dim = w2.shape[1]
    hidden_p = ((hidden + 127) // 128) * 128

    w1p = jnp.zeros((in_dim, hidden_p), compute_dtype)
    w1p = w1p.at[:, :hidden].set(w1.astype(compute_dtype))
    b1p = jnp.zeros((1, hidden_p), jnp.float32)
    b1p = b1p.at[0, :hidden].set(b1.astype(jnp.float32))
    w2p = jnp.zeros((hidden_p, out_dim), compute_dtype)
    w2p = w2p.at[:hidden, :].set(w2.astype(compute_dtype))
    b2p = b2.astype(jnp.float32).reshape(1, out_dim)
    return w1p, b1p, w2p, b2p


def qr_oracle_forward(x, w1p, b1p, w2p, b2p, num_action, num_atoms, batch_tile=None):
    """x: [bs, *state_shape] -> [bs, num_action, num_atoms] float32.

    Weights must come from prepare_params() ([in, out] layout, hidden padded).
    x stays float32 in HBM regardless of the weight compute dtype.
    """
    bs = x.shape[0]
    x_flat = x.reshape(bs, -1).astype(jnp.float32)   # free view (.view(bs,-1))
    in_dim = x_flat.shape[1]
    hidden_p = w1p.shape[1]
    out_dim = w2p.shape[1]
    assert out_dim == num_action * num_atoms
    assert w2p.shape[0] == hidden_p and b1p.shape == (1, hidden_p) and b2p.shape == (1, out_dim)

    tb = batch_tile if batch_tile is not None else _default_batch_tile(bs)
    grid = (pl.cdiv(bs, tb),)   # partial trailing tile handled by Pallas block clamping

    w_itemsize = jnp.dtype(w1p.dtype).itemsize
    cost = pl.CostEstimate(
        flops=2 * bs * (in_dim * hidden_p + hidden_p * out_dim),
        transcendentals=0,
        bytes_accessed=(bs * in_dim * 4                         # x stream in (f32)
                        + bs * out_dim * 4                      # out stream back (f32)
                        + (in_dim * hidden_p + hidden_p * out_dim) * w_itemsize
                        + (hidden_p + out_dim) * 4),            # resident weights/biases
    )

    out_flat = pl.pallas_call(
        _mlp_kernel,
        out_shape=jax.ShapeDtypeStruct((bs, out_dim), jnp.float32),
        grid_spec=pltpu.PrefetchScalarGridSpec(
            num_scalar_prefetch=0,
            grid=grid,
            in_specs=[
                pl.BlockSpec((tb, in_dim), lambda i: (i, 0)),        # streams with the grid
                pl.BlockSpec((in_dim, hidden_p), lambda i: (0, 0)),  # weights: constant block index
                pl.BlockSpec((1, hidden_p), lambda i: (0, 0)),       #  -> DMA'd once, VMEM-resident
                pl.BlockSpec((hidden_p, out_dim), lambda i: (0, 0)),
                pl.BlockSpec((1, out_dim), lambda i: (0, 0)),
            ],
            out_specs=pl.BlockSpec((tb, out_dim), lambda i: (i, 0)),
        ),
        compiler_params=pltpu.CompilerParams(
            dimension_semantics=("parallel",)),   # independent batch tiles; shards across v7x's 2 TCs
        cost_estimate=cost,
    )(x_flat, w1p, b1p, w2p, b2p)

    return out_flat.reshape(bs, num_action, num_atoms)  # glue: final view (free)


def init_params(key, state_shape=(7, 10), hidden=16, num_action=4, num_atoms=32):
    """Deterministic init mimicking torch.nn.Linear (uniform +/- 1/sqrt(fan_in)).
    Weights stored as [in, out]."""
    in_dim = int(np.prod(state_shape))
    out_dim = num_action * num_atoms
    k1, k2, k3, k4 = jax.random.split(key, 4)
    bound1 = 1.0 / np.sqrt(in_dim)
    bound2 = 1.0 / np.sqrt(hidden)
    w1 = jax.random.uniform(k1, (in_dim, hidden), jnp.float32, -bound1, bound1)
    b1 = jax.random.uniform(k2, (hidden,), jnp.float32, -bound1, bound1)
    w2 = jax.random.uniform(k3, (hidden, out_dim), jnp.float32, -bound2, bound2)
    b2 = jax.random.uniform(k4, (out_dim,), jnp.float32, -bound2, bound2)
    return w1, b1, w2, b2


if __name__ == "__main__":
    state_shape = (7, 10)
    hidden = 16
    num_action = 4
    num_atoms = 32
    batch = 2

    key = jax.random.PRNGKey(0)
    kx, kp = jax.random.split(key)
    x = jax.random.normal(kx, (batch,) + state_shape, dtype=jnp.float32)
    w1, b1, w2, b2 = init_params(kp, state_shape, hidden, num_action, num_atoms)

    # Pure-JAX reference (same math outside Pallas).
    x_flat = x.reshape(batch, -1)
    ref = jnp.maximum(x_flat @ w1 + b1, 0.0) @ w2 + b2
    ref = ref.reshape(batch, num_action, num_atoms)

    # f32 path: numerically faithful to the PyTorch module.
    p_f32 = prepare_params(w1, b1, w2, b2, compute_dtype=jnp.float32)
    out = qr_oracle_forward(x, *p_f32, num_action=num_action, num_atoms=num_atoms)
    out = jax.block_until_ready(out)
    np.testing.assert_allclose(np.asarray(out), np.asarray(ref), rtol=1e-5, atol=1e-5)

    # bf16 fast path: bf16 weights + in-kernel x cast; f32 MXU accumulation.
    p_bf16 = prepare_params(w1, b1, w2, b2, compute_dtype=jnp.bfloat16)
    out_bf = qr_oracle_forward(x, *p_bf16, num_action=num_action, num_atoms=num_atoms)
    out_bf = jax.block_until_ready(out_bf)
    np.testing.assert_allclose(np.asarray(out_bf), np.asarray(ref), rtol=2e-2, atol=2e-2)

    # Multi-tile path: exercises the batch grid (partial trailing tile included).
    big_batch = 2304   # 2 full 1024-row tiles + one 256-row partial tile
    xb = jax.random.normal(jax.random.PRNGKey(1), (big_batch,) + state_shape, jnp.float32)
    out_big = qr_oracle_forward(xb, *p_f32, num_action=num_action, num_atoms=num_atoms)
    out_big = jax.block_until_ready(out_big)
    ref_big = (jnp.maximum(xb.reshape(big_batch, -1) @ w1 + b1, 0.0) @ w2 + b2
               ).reshape(big_batch, num_action, num_atoms)
    np.testing.assert_allclose(np.asarray(out_big), np.asarray(ref_big), rtol=1e-5, atol=1e-5)

    assert out.shape == (batch, num_action, num_atoms)
    print("KERNEL_OK")
</pallas_src>

<mosaic_0001>
module attributes {stable_mosaic.version = 11 : i64} {
  func.func @_mlp_kernel(%arg0: i32, %arg1: memref<2x70xf32, #tpu.memory_space<vmem>>, %arg2: memref<70x128xf32, #tpu.memory_space<vmem>>, %arg3: memref<1x128xf32, #tpu.memory_space<vmem>>, %arg4: memref<128x128xf32, #tpu.memory_space<vmem>>, %arg5: memref<1x128xf32, #tpu.memory_space<vmem>>, %arg6: memref<2x128xf32, #tpu.memory_space<vmem>>) attributes {dimension_semantics = [#tpu.dimension_semantics<parallel>], iteration_bounds = array<i64: 1>, scalar_prefetch = 0 : i64, scratch_operands = 0 : i64, tpu.core_type = #tpu.core_type<tc>, window_params = [{transform_indices = @transform_0, window_bounds = array<i64: 2, 70>}, {pipeline_mode = #tpu.pipeline_mode<synchronous>, transform_indices = @transform_1, window_bounds = array<i64: 70, 128>}, {pipeline_mode = #tpu.pipeline_mode<synchronous>, transform_indices = @transform_2, window_bounds = array<i64: 1, 128>}, {pipeline_mode = #tpu.pipeline_mode<synchronous>, transform_indices = @transform_3, window_bounds = array<i64: 128, 128>}, {pipeline_mode = #tpu.pipeline_mode<synchronous>, transform_indices = @transform_4, window_bounds = array<i64: 1, 128>}, {transform_indices = @transform_5, window_bounds = array<i64: 2, 128>}]} {
    %c0 = arith.constant 0 : index
    %c0_0 = arith.constant 0 : index
    %0 = vector.load %arg1[%c0, %c0_0] : memref<2x70xf32, #tpu.memory_space<vmem>>, vector<2x70xf32>
    %c0_1 = arith.constant 0 : index
    %c0_2 = arith.constant 0 : index
    %1 = vector.load %arg2[%c0_1, %c0_2] : memref<70x128xf32, #tpu.memory_space<vmem>>, vector<70x128xf32>
    %cst = arith.constant dense<0.000000e+00> : vector<2x128xf32>
    %2 = tpu.matmul %0, %1, %cst {dimension_numbers = #tpu.dot_dimension_numbers<[1], [0], [0], [1], [0, 0, 1, 1], [], []>} : vector<2x70xf32>, vector<70x128xf32>, vector<2x128xf32> -> vector<2x128xf32>
    %c0_3 = arith.constant 0 : index
    %c0_4 = arith.constant 0 : index
    %3 = vector.load %arg3[%c0_3, %c0_4] : memref<1x128xf32, #tpu.memory_space<vmem>>, vector<1x128xf32>
    %4 = vector.broadcast %3 : vector<1x128xf32> to vector<2x128xf32>
    %5 = arith.addf %2, %4 : vector<2x128xf32>
    %cst_5 = arith.constant 0.000000e+00 : f32
    %6 = vector.broadcast %cst_5 : f32 to vector<2x128xf32>
    %7 = arith.maximumf %5, %6 : vector<2x128xf32>
    %c0_6 = arith.constant 0 : index
    %c0_7 = arith.constant 0 : index
    %8 = vector.load %arg4[%c0_6, %c0_7] : memref<128x128xf32, #tpu.memory_space<vmem>>, vector<128x128xf32>
    %cst_8 = arith.constant dense<0.000000e+00> : vector<2x128xf32>
    %9 = tpu.matmul %7, %8, %cst_8 {dimension_numbers = #tpu.dot_dimension_numbers<[1], [0], [0], [1], [0, 0, 1, 1], [], []>} : vector<2x128xf32>, vector<128x128xf32>, vector<2x128xf32> -> vector<2x128xf32>
    %c0_9 = arith.constant 0 : index
    %c0_10 = arith.constant 0 : index
    %10 = vector.load %arg5[%c0_9, %c0_10] : memref<1x128xf32, #tpu.memory_space<vmem>>, vector<1x128xf32>
    %11 = vector.broadcast %10 : vector<1x128xf32> to vector<2x128xf32>
    %12 = arith.addf %9, %11 : vector<2x128xf32>
    %c0_11 = arith.constant 0 : index
    %c0_12 = arith.constant 0 : index
    %13 = vector.load %arg6[%c0_11, %c0_12] : memref<2x128xf32, #tpu.memory_space<vmem>>, vector<2x128xf32>
    tpu.vector_store %arg6[%c0_11, %c0_12], %12 {strides = array<i32>} : memref<2x128xf32, #tpu.memory_space<vmem>>, vector<2x128xf32>,
    return
  }
  func.func @transform_0(%arg0: i32) -> (i32, i32) {
    %c0_i32 = arith.constant 0 : i32
    %c0_i32_0 = arith.constant 0 : i32
    return %arg0, %c0_i32 : i32, i32
  }
  func.func @transform_1(%arg0: i32) -> (i32, i32) {
    %c0_i32 = arith.constant 0 : i32
    %c0_i32_0 = arith.constant 0 : i32
    %c0_i32_1 = arith.constant 0 : i32
    return %c0_i32, %c0_i32_0 : i32, i32
  }
  func.func @transform_2(%arg0: i32) -> (i32, i32) {
    %c0_i32 = arith.constant 0 : i32
    %c0_i32_0 = arith.constant 0 : i32
    %c0_i32_1 = arith.constant 0 : i32
    return %c0_i32, %c0_i32_0 : i32, i32
  }
  func.func @transform_3(%arg0: i32) -> (i32, i32) {
    %c0_i32 = arith.constant 0 : i32
    %c0_i32_0 = arith.constant 0 : i32
    %c0_i32_1 = arith.constant 0 : i32
    return %c0_i32, %c0_i32_0 : i32, i32
  }
  func.func @transform_4(%arg0: i32) -> (i32, i32) {
    %c0_i32 = arith.constant 0 : i32
    %c0_i32_0 = arith.constant 0 : i32
    %c0_i32_1 = arith.constant 0 : i32
    return %c0_i32, %c0_i32_0 : i32, i32
  }
  func.func @transform_5(%arg0: i32) -> (i32, i32) {
    %c0_i32 = arith.constant 0 : i32
    %c0_i32_0 = arith.constant 0 : i32
    return %arg0, %c0_i32 : i32, i32
  }
}

</mosaic_0001>

<bundles_post_ra>
// kernel: tpu_custom_call.1
= control target key start
LH: loop header
LB: loop body
LE: loop exit
PB: predicated region body
PF: predicated region fallthrough
CT: control target
= control target key end

     0   :  { %10 = vsyncpa [#allocation3], 0  ;;  %s334_s0 = inlined_call_operand.hbm [shape: f32[2,70], index: 0, kind: input, shape index: {}]   ;;  %s335_s1 = inlined_call_operand.hbm [shape: f32[70,128], index: 1, kind: input, shape index: {}]   ;;  %s336_s2 = inlined_call_operand.vmem [shape: f32[1,128], index: 2, kind: input, shape index: {}]   ;;  %s337_s3 = inlined_call_operand.hbm [shape: f32[128,128], index: 3, kind: input, shape index: {}]   ;;  %s338_s4 = inlined_call_operand.vmem [shape: f32[1,128], index: 4, kind: input, shape index: {}]   ;;  %s339_s5 = inlined_call_operand.hbm [shape: f32[2,128], index: 5, kind: output, shape index: {}]  }
   0x1   :  { %11 = vsyncpa [#allocation6], 0  ;;  %s28_s20 = sshll.u32 %s335_s1, 4  ;;  %s29_s20 = int_to_ptr.hbm [resolvable:$true] %s28_s20 }
   0x2   :  { %12 = vsyncpa [#allocation4], 0  ;;  %s280_s21 = smov [#allocation5]   ;;  %s18_s25 = sshll.u32 %s334_s0, 4  ;;  %s19_s25 = int_to_ptr.hbm [resolvable:$true] %s18_s25 }
   0x3   :  { %s30_s22 = sshll.u32 %s280_s21, 4  ;;  %s281_s26 = smov 128   ;;  %s31_s22 = int_to_ptr.vmem [resolvable:$true] %s30_s22 }
   0x4   :  { %s282_s27 = smov 8   ;;  %s283_s28 = smov [#allocation2]  }
   0x5   :  { %36 = dma.hbm_to_vmem [thread:$0]  %s29_s20, 1152, %s31_s22, [#allocation6], %s281_s26, %s281_s26, %s282_s27  }
   0x6   :  { %s20_s29 = sshll.u32 %s283_s28, 4  ;;  %s43_s7 = sshll.u32 %s337_s3, 4  ;;  %s21_s29 = int_to_ptr.vmem [resolvable:$true] %s20_s29  ;;  %s44_s7 = int_to_ptr.hbm [resolvable:$true] %s43_s7 }
   0x7   :  { %23 = dma.hbm_to_vmem [thread:$0]  %s19_s25, 32, %s21_s29, [#allocation3]  }
   0x8   :  { %s284_s1 = smov [#allocation7]  }
   0x9   :  { %s45_s8 = sshll.u32 %s284_s1, 4  ;;  %s46_s8 = int_to_ptr.vmem [resolvable:$true] %s45_s8 }
   0xa   :  { %51 = dma.hbm_to_vmem [thread:$0]  %s44_s7, 2048, %s46_s8, [#allocation6], %s281_s26, %s281_s26, %s282_s27  }
   0xb   :  { %274 = dma.done.wait [#allocation3], 32  }
   0xc   :  { %275 = vsyncadd [#allocation3], 4294967264 }
   0xd   :  { %276 = dma.done.wait [#allocation6], 3200  }
   0xe   :  { %277 = vsyncadd [#allocation6], 4294964096  ;;  %vm84_vm0 = vcmask 1045504   ;;  %v75_v0 = vld [vmem:[#allocation5 + $0x40] sm:$0x3f]  ;;  %v74_v1 = vld [vmem:[#allocation5 + $0x38] sm:$0xff] }
   0xf   :  { %168 = vmatpush.msk.msra.mxu0 %vm84_vm0, %v75_v0  ;;  %v73_v2 = vld [vmem:[#allocation5 + $0x30] sm:$0xff]  ;;  %v124_v3 = vld [vmem:[#allocation7 + $0x78] sm:$0xff]  ;;  %v123_v4 = vld [vmem:[#allocation7 + $0x70] sm:$0xff]  ;;  %vm80_vm1 = vcmask 572416   ;;  %s285_s11 = smov [#allocation8]   ;;  %s157_s15 = sshll.u32 %s339_s5, 4  ;;  %s158_s15 = int_to_ptr.hbm [resolvable:$true] %s157_s15 }
  0x10   :  { %v72_v5 = vld [vmem:[#allocation5 + $0x28] sm:$0xff]  ;;  %129 = vmatpush.msra.mxu1 %v124_v3  ;;  %v122_v6 = vld [vmem:[#allocation7 + $0x68] sm:$0xff]  ;;  %v71_v7 = vld [vmem:[#allocation5 + $0x20] sm:$0xff]  ;;  %s155_s12 = sshll.u32 %s285_s11, 4  ;;  %s156_s12 = int_to_ptr.vmem [resolvable:$true] %s155_s12 }
  0x11   :  { %96 = vmatpush.msra.mxu0 %v74_v1  ;;  %v121_v8 = vld [vmem:[#allocation7 + $0x60] sm:$0xff]  ;;  %v70_v9 = vld [vmem:[#allocation5 + $0x18] sm:$0xff]  ;;  %v120_v10 = vld [vmem:[#allocation7 + $0x58] sm:$0xff] }
  0x12   :  { %130 = vmatpush.msra.mxu1 %v123_v4  ;;  %v69_v11 = vld [vmem:[#allocation5 + $0x10] sm:$0xff]  ;;  %v119_v12 = vld [vmem:[#allocation7 + $0x50] sm:$0xff]  ;;  %v68_v13 = vld [vmem:[#allocation5 + $0x8] sm:$0xff] }
  0x13   :  { %97 = vmatpush.msra.mxu0 %v73_v2  ;;  %v118_v14 = vld [vmem:[#allocation7 + $0x48] sm:$0xff]  ;;  %v67_v15 = vld [vmem:[#allocation5] sm:$0xff]  ;;  %v66_v16 = vld [vmem:[#allocation2] sm:$0x3] }
  0x14   :  { %131 = vmatpush.msra.mxu1 %v122_v6  ;;  %v117_v17 = vld [vmem:[#allocation7 + $0x40] sm:$0xff]  ;;  %v116_v18 = vld [vmem:[#allocation7 + $0x38] sm:$0xff]  ;;  %v115_v19 = vld [vmem:[#allocation7 + $0x30] sm:$0xff] }
  0x15   :  { %98 = vmatpush.msra.mxu0 %v72_v5  ;;  %v114_v20 = vld [vmem:[#allocation7 + $0x28] sm:$0xff]  ;;  %v113_v21 = vld [vmem:[#allocation7 + $0x20] sm:$0xff]  ;;  %v112_v22 = vld [vmem:[#allocation7 + $0x18] sm:$0xff] }
  0x16   :  { %132 = vmatpush.msra.mxu1 %v121_v8  ;;  %v111_v23 = vld [vmem:[#allocation7 + $0x10] sm:$0xff]  ;;  %v110_v24 = vld [vmem:[#allocation7 + $0x8] sm:$0xff]  ;;  %v109_v25 = vld [vmem:[#allocation7] sm:$0xff] }
  0x17   :  { %99 = vmatpush.msra.mxu0 %v71_v7  ;;  %v176_v26 = vld [vmem:[%s336_s2] ss:$0 sm:$0xff] }
  0x18   :  { %133 = vmatpush.msra.mxu1 %v120_v10  ;;  %v177_v30 = vld [vmem:[%s338_s4] ss:$0 sm:$0xff] }
  0x19   :  { %100 = vmatpush.msra.mxu0 %v70_v9 }
  0x1a   :  { %134 = vmatpush.msra.mxu1 %v119_v12 }
  0x1b   :  { %101 = vmatpush.msra.mxu0 %v69_v11 }
  0x1c   :  { %135 = vmatpush.msra.mxu1 %v118_v14 }
  0x1d   :  { %102 = vmatpush.msra.mxu0 %v68_v13 }
  0x1e   :  { %136 = vmatpush.msra.mxu1 %v117_v17 }
  0x1f   :  { %103 = vmatpush.msra.mxu0 %v67_v15 }
  0x20   :  { %169 = vmatmul.msk.f32.vlgmr.msra.gmra.mxu0 %vm80_vm1, %v66_v16  ;;  %137 = vmatpush.msra.mxu1 %v116_v18 }
  0x22   :  { %138 = vmatpush.msra.mxu1 %v115_v19 }
  0x24   :  { %139 = vmatpush.msra.mxu1 %v114_v20 }
  0x26   :  { %140 = vmatpush.msra.mxu1 %v113_v21 }
  0x28   :  { %141 = vmatpush.msra.mxu1 %v112_v22 }
  0x2a   :  { %142 = vmatpush.msra.mxu1 %v111_v23 }
  0x2c   :  { %143 = vmatpush.msra.mxu1 %v110_v24 }
  0x2e   :  { %144 = vmatpush.msra.mxu1 %v109_v25 }
  0x9d   :  { %v105_v27 = vpop.f32.mrf.mxu0 }
  0x9e   :  { %v106_v28 = vadd.f32 %v176_v26, %v105_v27 }
  0xa0   :  { %v108_v29 = vmax.f32 %v106_v28, 0.0 }
  0xa2   :  { %145 = vmatmul.f32.vlgmr.msra.gmra.mxu1 %v108_v29 }
 0x11f   :  { %v146_v31 = vpop.f32.mrf.mxu1 }
 0x120   :  { %v147_v32 = vadd.f32 %v177_v30, %v146_v31 }
 0x122   :  { %149 = vst [vmem:[#allocation8] sm:$0x3] %v147_v32 }
 0x123   :  { %160 = dma.vmem_to_hbm [thread:$0]  %s156_s12, 32, %s158_s15, [#allocation4]  }
 0x124   :  { %278 = dma.done.wait [#allocation4], 32  }
 0x125   :  { %279 = vsyncadd [#allocation4], 4294967264 }
 0x126   :  { %165 = vsyncpa [#allocation3], 1 }
 0x127   :  { %166 = vsyncpa [#allocation6], 1 }
 0x128   :  { %167 = vsyncpa [#allocation4], 1 }

</bundles_post_ra>
